<compile_context>
chip_gen: v5e
topology: v5e:2x2
jax: 0.10.0
libtpu: 0.0.40
codegen_flags: <defaults>
</compile_context>

<pallas_src>
import numpy as np
import jax
import jax.numpy as jnp
from jax import lax
from jax.experimental import pallas as pl
from jax.experimental.pallas import tpu as pltpu

BN_EPS = 1e-5


# ---------------------------------------------------------------------------
# Fused kernel: (grouped conv3x3 + BN + ReLU) x 2 for a block of batch images
# ---------------------------------------------------------------------------
def _conv_block_group_kernel(x_ref, w1_ref, b1_ref, w2_ref, b2_ref, o_ref,
                             xpad_ref, mid_ref):
    """
    x_ref   : (NB, H, W*Cin)          lane-dense, unpadded NHWC input block
    w1_ref  : (3, W*Cin, W*Cmid)      BN-folded Toeplitz conv1 weights (per ky)
    b1_ref  : (1, W*Cmid)             BN-folded conv1 bias, tiled over width
    w2_ref  : (3, W*Cmid, W*Cout)     BN-folded Toeplitz conv2 weights (per ky)
    b2_ref  : (1, W*Cout)             BN-folded conv2 bias, tiled over width
    o_ref   : (NB, H, W*Cout)         lane-dense output block
    xpad_ref: (NB, H+2, W*Cin)        VMEM scratch: input with height halo rows
    mid_ref : (NB, H+2, W*Cmid)       VMEM scratch: ReLU'd intermediate + halo
    """
    nb, h, wcin = x_ref.shape
    wcmid = w1_ref.shape[2]
    wcout = o_ref.shape[2]

    # --- build the height halo (width padding is folded into the weights) ---
    # Only the two halo rows are zeroed (borders are cheap; unconditional so it
    # is correct under v7x megacore where each core owns its own scratch).
    xpad_ref[:, 0:1, :] = jnp.zeros((nb, 1, wcin), jnp.float32)
    xpad_ref[:, h + 1:h + 2, :] = jnp.zeros((nb, 1, wcin), jnp.float32)
    xpad_ref[:, 1:h + 1, :] = x_ref[...].astype(jnp.float32)

    # --- conv1 + BN1 + ReLU ------------------------------------------------
    acc1 = jnp.dot(xpad_ref[:, 0:h, :].reshape(nb * h, wcin), w1_ref[0],
                   preferred_element_type=jnp.float32)
    for ky in (1, 2):
        acc1 = acc1 + jnp.dot(xpad_ref[:, ky:ky + h, :].reshape(nb * h, wcin),
                              w1_ref[ky], preferred_element_type=jnp.float32)
    h1 = jnp.maximum(acc1 + b1_ref[...], 0.0)          # (NB*H, W*Cmid)

    mid_ref[:, 0:1, :] = jnp.zeros((nb, 1, wcmid), jnp.float32)
    mid_ref[:, h + 1:h + 2, :] = jnp.zeros((nb, 1, wcmid), jnp.float32)
    mid_ref[:, 1:h + 1, :] = h1.reshape(nb, h, wcmid)

    # --- conv2 + BN2 + ReLU (intermediate never leaves VMEM) ----------------
    acc2 = jnp.dot(mid_ref[:, 0:h, :].reshape(nb * h, wcmid), w2_ref[0],
                   preferred_element_type=jnp.float32)
    for ky in (1, 2):
        acc2 = acc2 + jnp.dot(mid_ref[:, ky:ky + h, :].reshape(nb * h, wcmid),
                              w2_ref[ky], preferred_element_type=jnp.float32)
    h2 = jnp.maximum(acc2 + b2_ref[...], 0.0)           # (NB*H, W*Cout)

    o_ref[...] = h2.reshape(nb, h, wcout).astype(o_ref.dtype)


# ---------------------------------------------------------------------------
# Parameter preprocessing (pure JAX; runs under jit with the forward pass)
# ---------------------------------------------------------------------------
def _fold_bn(w, gamma, beta, mean, var, eps=BN_EPS):
    """Fold inference-mode BatchNorm into the (bias-free) conv: scale + bias."""
    scale = gamma / jnp.sqrt(var + eps)
    w_folded = w * scale[:, None, None, None]            # (Cout, Cin_g, 3, 3)
    bias = beta - mean * scale
    return w_folded, bias


def _grouped_taps(w, groups):
    """(Cout, Cin/g, 3, 3) grouped weight -> (3, 3, Cin, Cout) block-diag taps."""
    cout, cin_g, kh, kw = w.shape
    cout_g = cout // groups
    cin = cin_g * groups
    taps = jnp.zeros((kh, kw, cin, cout), w.dtype)
    for g in range(groups):
        wg = jnp.transpose(w[g * cout_g:(g + 1) * cout_g], (2, 3, 1, 0))
        taps = taps.at[:, :, g * cin_g:(g + 1) * cin_g,
                             g * cout_g:(g + 1) * cout_g].set(wg)
    return taps


def _toeplitz_weights(taps, width):
    """Fold the 3 width taps + zero width-padding into one matrix per ky.

    taps: (3, 3, Cin, Cout)  ->  (3, width*Cin, width*Cout) where
    B[ky, w'*Cin+ci, w*Cout+co] = taps[ky, w'-w+1, ci, co]  (0 elsewhere).
    """
    kh, kw, cin, cout = taps.shape
    wp = jnp.arange(width)[:, None]
    wo = jnp.arange(width)[None, :]
    sel = jnp.stack([(wp == wo + kx - 1) for kx in range(kw)], 0)  # (3, W, W)
    sel = sel.astype(taps.dtype)
    b = jnp.einsum('xpw,yxio->ypiwo', sel, taps)
    return b.reshape(kh, width * cin, width * cout)


def _pick_batch_block(n, h, w, cin, cmid, cout, vmem_budget=8 << 20):
    """Largest divisor of n that keeps >=2 grid steps (megacore / pipeline)
    and a per-step working set under the VMEM budget."""
    per_image = 4 * (2 * h * w * (cin + cout)            # double-buffered I/O
                     + (h + 2) * w * (cin + cmid))       # padded scratches
    best = 1
    for nb in range(1, n + 1):
        if n % nb != 0:
            continue
        if n >= 2 and n // nb < 2:
            continue
        if nb * per_image > vmem_budget:
            continue
        best = nb
    return best


# ---------------------------------------------------------------------------
# Forward wrapper
# ---------------------------------------------------------------------------
def conv_block_group_forward(x_nchw, params, *, group_num=2, batch_block=None):
    (w1, g1, be1, m1, v1, w2, g2, be2, m2, v2) = params
    n, cin, h, w = x_nchw.shape
    cmid = w1.shape[0]
    cout = w2.shape[0]

    # TODO(synk): training-mode BatchNorm (batch statistics / running-stat
    # updates) is not implemented; inference-mode running stats are folded in.
    w1f, b1 = _fold_bn(w1, g1, be1, m1, v1)
    w2f, b2 = _fold_bn(w2, g2, be2, m2, v2)
    t1 = _grouped_taps(w1f, group_num)                    # (3, 3, cin,  cmid)
    t2 = _grouped_taps(w2f, group_num)                    # (3, 3, cmid, cout)
    tw1 = _toeplitz_weights(t1, w)                        # (3, w*cin,  w*cmid)
    tw2 = _toeplitz_weights(t2, w)                        # (3, w*cmid, w*cout)
    b1l = jnp.tile(b1, w).reshape(1, w * cmid)
    b2l = jnp.tile(b2, w).reshape(1, w * cout)

    # Single layout conversion to honor the PyTorch NCHW interface; the reshape
    # to (n, h, w*cin) is a free reinterpretation of contiguous NHWC.
    x_lane = jnp.transpose(x_nchw, (0, 2, 3, 1)).reshape(n, h, w * cin)

    nb = batch_block if batch_block is not None else _pick_batch_block(
        n, h, w, cin, cmid, cout)
    assert n % nb == 0, "batch_block must divide the batch size"
    grid = (n // nb,)

    # Explicit VMEM budget derived from the per-step working set (keeps the
    # same tiling valid on v7x's smaller 64 MiB VMEM).
    per_step_bytes = 4 * (2 * nb * h * w * (cin + cout)
                          + nb * (h + 2) * w * (cin + cmid)
                          + 2 * (tw1.size + tw2.size + b1l.size + b2l.size))
    vmem_limit = int(min(max(2 * per_step_bytes, 16 << 20), 48 << 20))

    # Honest (grouped) conv FLOPs, not the zero-padded Toeplitz FLOPs.
    flops = 2 * n * h * w * 9 * (cmid * (cin // group_num)
                                 + cout * (cmid // group_num))
    bytes_accessed = 4 * (x_lane.size + n * h * w * cout
                          + tw1.size + tw2.size + b1l.size + b2l.size)

    out_lane = pl.pallas_call(
        _conv_block_group_kernel,
        out_shape=jax.ShapeDtypeStruct((n, h, w * cout), x_nchw.dtype),
        grid_spec=pltpu.PrefetchScalarGridSpec(
            num_scalar_prefetch=0,
            grid=grid,
            in_specs=[
                pl.BlockSpec((nb, h, w * cin), lambda i: (i, 0, 0)),       # x
                pl.BlockSpec((3, w * cin, w * cmid), lambda i: (0, 0, 0)),  # W1
                pl.BlockSpec((1, w * cmid), lambda i: (0, 0)),              # b1
                pl.BlockSpec((3, w * cmid, w * cout), lambda i: (0, 0, 0)),  # W2
                pl.BlockSpec((1, w * cout), lambda i: (0, 0)),              # b2
            ],
            out_specs=pl.BlockSpec((nb, h, w * cout), lambda i: (i, 0, 0)),
            scratch_shapes=[
                pltpu.VMEM((nb, h + 2, w * cin), jnp.float32),
                pltpu.VMEM((nb, h + 2, w * cmid), jnp.float32),
            ],
        ),
        compiler_params=pltpu.CompilerParams(
            dimension_semantics=("parallel",),            # batch-parallel
            vmem_limit_bytes=vmem_limit,
        ),
        cost_estimate=pl.CostEstimate(
            flops=flops, transcendentals=0, bytes_accessed=bytes_accessed),
    )(x_lane, tw1, b1l, tw2, b2l)

    # Back to the module's NCHW output layout (single conversion out).
    return jnp.transpose(out_lane.reshape(n, h, w, cout), (0, 3, 1, 2))


# ---------------------------------------------------------------------------
# Pure-JAX reference (exact module semantics, eval mode)
# ---------------------------------------------------------------------------
def conv_block_group_reference(x, params, *, group_num=2, eps=BN_EPS):
    (w1, g1, be1, m1, v1, w2, g2, be2, m2, v2) = params

    def conv_bn_relu(x, w, gamma, beta, mean, var):
        y = lax.conv_general_dilated(
            x, w, window_strides=(1, 1), padding=((1, 1), (1, 1)),
            dimension_numbers=("NCHW", "OIHW", "NCHW"),
            feature_group_count=group_num,
            precision=lax.Precision.HIGHEST)
        s = gamma / jnp.sqrt(var + eps)
        b = beta - mean * s
        y = y * s[None, :, None, None] + b[None, :, None, None]
        return jnp.maximum(y, 0.0)

    y = conv_bn_relu(x, w1, g1, be1, m1, v1)
    return conv_bn_relu(y, w2, g2, be2, m2, v2)


def init_params(key, ch_in, ch_out, group_num):
    ks = jax.random.split(key, 10)
    w1 = 0.2 * jax.random.normal(ks[0], (ch_out, ch_in // group_num, 3, 3), jnp.float32)
    g1 = jax.random.uniform(ks[1], (ch_out,), jnp.float32, 0.5, 1.5)
    be1 = 0.1 * jax.random.normal(ks[2], (ch_out,), jnp.float32)
    m1 = 0.1 * jax.random.normal(ks[3], (ch_out,), jnp.float32)
    v1 = jax.random.uniform(ks[4], (ch_out,), jnp.float32, 0.5, 1.5)
    w2 = 0.2 * jax.random.normal(ks[5], (ch_out, ch_out // group_num, 3, 3), jnp.float32)
    g2 = jax.random.uniform(ks[6], (ch_out,), jnp.float32, 0.5, 1.5)
    be2 = 0.1 * jax.random.normal(ks[7], (ch_out,), jnp.float32)
    m2 = 0.1 * jax.random.normal(ks[8], (ch_out,), jnp.float32)
    v2 = jax.random.uniform(ks[9], (ch_out,), jnp.float32, 0.5, 1.5)
    return (w1, g1, be1, m1, v1, w2, g2, be2, m2, v2)


if __name__ == "__main__":
    key = jax.random.PRNGKey(0)
    kx, kp = jax.random.split(key)

    # Small shapes consistent with the module (group_num=2 grouped convs).
    # W*CH_OUT = 128, so the kernel's output stores are exactly one full vreg
    # lane-width per row.
    N, CH_IN, CH_OUT, H, W = 2, 4, 8, 16, 16
    GROUP_NUM = 2

    x = jax.random.normal(kx, (N, CH_IN, H, W), dtype=jnp.float32)
    params = init_params(kp, CH_IN, CH_OUT, GROUP_NUM)

    # jit the whole forward so the BN folding / Toeplitz weight construction is
    # compiled once with the kernel instead of re-traced per call.
    fwd = jax.jit(lambda xx, pp: conv_block_group_forward(
        xx, pp, group_num=GROUP_NUM))
    out = jax.block_until_ready(fwd(x, params))

    ref = conv_block_group_reference(x, params, group_num=GROUP_NUM)
    np.testing.assert_allclose(np.asarray(out), np.asarray(ref),
                               rtol=1e-3, atol=1e-3)

    assert out.shape == (N, CH_OUT, H, W)
    print("KERNEL_OK")
</pallas_src>

<mosaic_0001>
module attributes {stable_mosaic.version = 11 : i64} {
  func.func @_conv_block_group_kernel(%arg0: i32, %arg1: memref<1x16x64xf32, #tpu.memory_space<vmem>>, %arg2: memref<3x64x128xf32, #tpu.memory_space<vmem>>, %arg3: memref<1x128xf32, #tpu.memory_space<vmem>>, %arg4: memref<3x128x128xf32, #tpu.memory_space<vmem>>, %arg5: memref<1x128xf32, #tpu.memory_space<vmem>>, %arg6: memref<1x16x128xf32, #tpu.memory_space<vmem>>, %arg7: memref<1x18x64xf32, #tpu.memory_space<vmem>>, %arg8: memref<1x18x128xf32, #tpu.memory_space<vmem>>) attributes {dimension_semantics = [#tpu.dimension_semantics<parallel>], iteration_bounds = array<i64: 2>, scalar_prefetch = 0 : i64, scratch_operands = 2 : i64, tpu.core_type = #tpu.core_type<tc>, window_params = [{transform_indices = @transform_0, window_bounds = array<i64: 1, 16, 64>}, {pipeline_mode = #tpu.pipeline_mode<synchronous>, transform_indices = @transform_1, window_bounds = array<i64: 3, 64, 128>}, {pipeline_mode = #tpu.pipeline_mode<synchronous>, transform_indices = @transform_2, window_bounds = array<i64: 1, 128>}, {pipeline_mode = #tpu.pipeline_mode<synchronous>, transform_indices = @transform_3, window_bounds = array<i64: 3, 128, 128>}, {pipeline_mode = #tpu.pipeline_mode<synchronous>, transform_indices = @transform_4, window_bounds = array<i64: 1, 128>}, {transform_indices = @transform_5, window_bounds = array<i64: 1, 16, 128>}]} {
    %cst = arith.constant 0.000000e+00 : f32
    %0 = vector.broadcast %cst : f32 to vector<1x1x64xf32>
    %c0 = arith.constant 0 : index
    %c0_0 = arith.constant 0 : index
    %c0_1 = arith.constant 0 : index
    %1 = vector.load %arg7[%c0, %c0_0, %c0_1] : memref<1x18x64xf32, #tpu.memory_space<vmem>>, vector<1x1x64xf32>
    tpu.vector_store %arg7[%c0, %c0_0, %c0_1], %0 {strides = array<i32>} : memref<1x18x64xf32, #tpu.memory_space<vmem>>, vector<1x1x64xf32>,
    %cst_2 = arith.constant 0.000000e+00 : f32
    %2 = vector.broadcast %cst_2 : f32 to vector<1x1x64xf32>
    %c0_3 = arith.constant 0 : index
    %c17 = arith.constant 17 : index
    %c0_4 = arith.constant 0 : index
    %3 = vector.load %arg7[%c0_3, %c17, %c0_4] : memref<1x18x64xf32, #tpu.memory_space<vmem>>, vector<1x1x64xf32>
    tpu.vector_store %arg7[%c0_3, %c17, %c0_4], %2 {strides = array<i32>} : memref<1x18x64xf32, #tpu.memory_space<vmem>>, vector<1x1x64xf32>,
    %c0_5 = arith.constant 0 : index
    %c0_6 = arith.constant 0 : index
    %c0_7 = arith.constant 0 : index
    %4 = vector.load %arg1[%c0_5, %c0_6, %c0_7] : memref<1x16x64xf32, #tpu.memory_space<vmem>>, vector<1x16x64xf32>
    %c0_8 = arith.constant 0 : index
    %c1 = arith.constant 1 : index
    %c0_9 = arith.constant 0 : index
    %5 = vector.load %arg7[%c0_8, %c1, %c0_9] : memref<1x18x64xf32, #tpu.memory_space<vmem>>, vector<1x16x64xf32>
    tpu.vector_store %arg7[%c0_8, %c1, %c0_9], %4 {strides = array<i32>} : memref<1x18x64xf32, #tpu.memory_space<vmem>>, vector<1x16x64xf32>,
    %c0_10 = arith.constant 0 : index
    %c0_11 = arith.constant 0 : index
    %c0_12 = arith.constant 0 : index
    %6 = vector.load %arg7[%c0_10, %c0_11, %c0_12] : memref<1x18x64xf32, #tpu.memory_space<vmem>>, vector<1x16x64xf32>
    %7 = vector.shape_cast %6 : vector<1x16x64xf32> to vector<16x64xf32>
    %c0_13 = arith.constant 0 : index
    %c0_14 = arith.constant 0 : index
    %c0_15 = arith.constant 0 : index
    %8 = vector.load %arg2[%c0_13, %c0_14, %c0_15] : memref<3x64x128xf32, #tpu.memory_space<vmem>>, vector<1x64x128xf32>
    %9 = vector.shape_cast %8 : vector<1x64x128xf32> to vector<64x128xf32>
    %cst_16 = arith.constant dense<0.000000e+00> : vector<16x128xf32>
    %10 = tpu.matmul %7, %9, %cst_16 {dimension_numbers = #tpu.dot_dimension_numbers<[1], [0], [0], [1], [0, 0, 1, 1], [], []>} : vector<16x64xf32>, vector<64x128xf32>, vector<16x128xf32> -> vector<16x128xf32>
    %c0_17 = arith.constant 0 : index
    %c1_18 = arith.constant 1 : index
    %c0_19 = arith.constant 0 : index
    %11 = vector.load %arg7[%c0_17, %c1_18, %c0_19] : memref<1x18x64xf32, #tpu.memory_space<vmem>>, vector<1x16x64xf32>
    %12 = vector.shape_cast %11 : vector<1x16x64xf32> to vector<16x64xf32>
    %c1_20 = arith.constant 1 : index
    %c0_21 = arith.constant 0 : index
    %c0_22 = arith.constant 0 : index
    %13 = vector.load %arg2[%c1_20, %c0_21, %c0_22] : memref<3x64x128xf32, #tpu.memory_space<vmem>>, vector<1x64x128xf32>
    %14 = vector.shape_cast %13 : vector<1x64x128xf32> to vector<64x128xf32>
    %cst_23 = arith.constant dense<0.000000e+00> : vector<16x128xf32>
    %15 = tpu.matmul %12, %14, %cst_23 {dimension_numbers = #tpu.dot_dimension_numbers<[1], [0], [0], [1], [0, 0, 1, 1], [], []>} : vector<16x64xf32>, vector<64x128xf32>, vector<16x128xf32> -> vector<16x128xf32>
    %16 = arith.addf %10, %15 : vector<16x128xf32>
    %c0_24 = arith.constant 0 : index
    %c2 = arith.constant 2 : index
    %c0_25 = arith.constant 0 : index
    %17 = vector.load %arg7[%c0_24, %c2, %c0_25] : memref<1x18x64xf32, #tpu.memory_space<vmem>>, vector<1x16x64xf32>
    %18 = vector.shape_cast %17 : vector<1x16x64xf32> to vector<16x64xf32>
    %c2_26 = arith.constant 2 : index
    %c0_27 = arith.constant 0 : index
    %c0_28 = arith.constant 0 : index
    %19 = vector.load %arg2[%c2_26, %c0_27, %c0_28] : memref<3x64x128xf32, #tpu.memory_space<vmem>>, vector<1x64x128xf32>
    %20 = vector.shape_cast %19 : vector<1x64x128xf32> to vector<64x128xf32>
    %cst_29 = arith.constant dense<0.000000e+00> : vector<16x128xf32>
    %21 = tpu.matmul %18, %20, %cst_29 {dimension_numbers = #tpu.dot_dimension_numbers<[1], [0], [0], [1], [0, 0, 1, 1], [], []>} : vector<16x64xf32>, vector<64x128xf32>, vector<16x128xf32> -> vector<16x128xf32>
    %22 = arith.addf %16, %21 : vector<16x128xf32>
    %c0_30 = arith.constant 0 : index
    %c0_31 = arith.constant 0 : index
    %23 = vector.load %arg3[%c0_30, %c0_31] : memref<1x128xf32, #tpu.memory_space<vmem>>, vector<1x128xf32>
    %24 = vector.broadcast %23 : vector<1x128xf32> to vector<16x128xf32>
    %25 = arith.addf %22, %24 : vector<16x128xf32>
    %cst_32 = arith.constant 0.000000e+00 : f32
    %26 = vector.broadcast %cst_32 : f32 to vector<16x128xf32>
    %27 = arith.maximumf %25, %26 : vector<16x128xf32>
    %cst_33 = arith.constant 0.000000e+00 : f32
    %28 = vector.broadcast %cst_33 : f32 to vector<1x1x128xf32>
    %c0_34 = arith.constant 0 : index
    %c0_35 = arith.constant 0 : index
    %c0_36 = arith.constant 0 : index
    %29 = vector.load %arg8[%c0_34, %c0_35, %c0_36] : memref<1x18x128xf32, #tpu.memory_space<vmem>>, vector<1x1x128xf32>
    tpu.vector_store %arg8[%c0_34, %c0_35, %c0_36], %28 {strides = array<i32>} : memref<1x18x128xf32, #tpu.memory_space<vmem>>, vector<1x1x128xf32>,
    %cst_37 = arith.constant 0.000000e+00 : f32
    %30 = vector.broadcast %cst_37 : f32 to vector<1x1x128xf32>
    %c0_38 = arith.constant 0 : index
    %c17_39 = arith.constant 17 : index
    %c0_40 = arith.constant 0 : index
    %31 = vector.load %arg8[%c0_38, %c17_39, %c0_40] : memref<1x18x128xf32, #tpu.memory_space<vmem>>, vector<1x1x128xf32>
    tpu.vector_store %arg8[%c0_38, %c17_39, %c0_40], %30 {strides = array<i32>} : memref<1x18x128xf32, #tpu.memory_space<vmem>>, vector<1x1x128xf32>,
    %32 = vector.shape_cast %27 : vector<16x128xf32> to vector<1x16x128xf32>
    %c0_41 = arith.constant 0 : index
    %c1_42 = arith.constant 1 : index
    %c0_43 = arith.constant 0 : index
    %33 = vector.load %arg8[%c0_41, %c1_42, %c0_43] : memref<1x18x128xf32, #tpu.memory_space<vmem>>, vector<1x16x128xf32>
    tpu.vector_store %arg8[%c0_41, %c1_42, %c0_43], %32 {strides = array<i32>} : memref<1x18x128xf32, #tpu.memory_space<vmem>>, vector<1x16x128xf32>,
    %c0_44 = arith.constant 0 : index
    %c0_45 = arith.constant 0 : index
    %c0_46 = arith.constant 0 : index
    %34 = vector.load %arg8[%c0_44, %c0_45, %c0_46] : memref<1x18x128xf32, #tpu.memory_space<vmem>>, vector<1x16x128xf32>
    %35 = vector.shape_cast %34 : vector<1x16x128xf32> to vector<16x128xf32>
    %c0_47 = arith.constant 0 : index
    %c0_48 = arith.constant 0 : index
    %c0_49 = arith.constant 0 : index
    %36 = vector.load %arg4[%c0_47, %c0_48, %c0_49] : memref<3x128x128xf32, #tpu.memory_space<vmem>>, vector<1x128x128xf32>
    %37 = vector.shape_cast %36 : vector<1x128x128xf32> to vector<128x128xf32>
    %cst_50 = arith.constant dense<0.000000e+00> : vector<16x128xf32>
    %38 = tpu.matmul %35, %37, %cst_50 {dimension_numbers = #tpu.dot_dimension_numbers<[1], [0], [0], [1], [0, 0, 1, 1], [], []>} : vector<16x128xf32>, vector<128x128xf32>, vector<16x128xf32> -> vector<16x128xf32>
    %c0_51 = arith.constant 0 : index
    %c1_52 = arith.constant 1 : index
    %c0_53 = arith.constant 0 : index
    %39 = vector.load %arg8[%c0_51, %c1_52, %c0_53] : memref<1x18x128xf32, #tpu.memory_space<vmem>>, vector<1x16x128xf32>
    %40 = vector.shape_cast %39 : vector<1x16x128xf32> to vector<16x128xf32>
    %c1_54 = arith.constant 1 : index
    %c0_55 = arith.constant 0 : index
    %c0_56 = arith.constant 0 : index
    %41 = vector.load %arg4[%c1_54, %c0_55, %c0_56] : memref<3x128x128xf32, #tpu.memory_space<vmem>>, vector<1x128x128xf32>
    %42 = vector.shape_cast %41 : vector<1x128x128xf32> to vector<128x128xf32>
    %cst_57 = arith.constant dense<0.000000e+00> : vector<16x128xf32>
    %43 = tpu.matmul %40, %42, %cst_57 {dimension_numbers = #tpu.dot_dimension_numbers<[1], [0], [0], [1], [0, 0, 1, 1], [], []>} : vector<16x128xf32>, vector<128x128xf32>, vector<16x128xf32> -> vector<16x128xf32>
    %44 = arith.addf %38, %43 : vector<16x128xf32>
    %c0_58 = arith.constant 0 : index
    %c2_59 = arith.constant 2 : index
    %c0_60 = arith.constant 0 : index
    %45 = vector.load %arg8[%c0_58, %c2_59, %c0_60] : memref<1x18x128xf32, #tpu.memory_space<vmem>>, vector<1x16x128xf32>
    %46 = vector.shape_cast %45 : vector<1x16x128xf32> to vector<16x128xf32>
    %c2_61 = arith.constant 2 : index
    %c0_62 = arith.constant 0 : index
    %c0_63 = arith.constant 0 : index
    %47 = vector.load %arg4[%c2_61, %c0_62, %c0_63] : memref<3x128x128xf32, #tpu.memory_space<vmem>>, vector<1x128x128xf32>
    %48 = vector.shape_cast %47 : vector<1x128x128xf32> to vector<128x128xf32>
    %cst_64 = arith.constant dense<0.000000e+00> : vector<16x128xf32>
    %49 = tpu.matmul %46, %48, %cst_64 {dimension_numbers = #tpu.dot_dimension_numbers<[1], [0], [0], [1], [0, 0, 1, 1], [], []>} : vector<16x128xf32>, vector<128x128xf32>, vector<16x128xf32> -> vector<16x128xf32>
    %50 = arith.addf %44, %49 : vector<16x128xf32>
    %c0_65 = arith.constant 0 : index
    %c0_66 = arith.constant 0 : index
    %51 = vector.load %arg5[%c0_65, %c0_66] : memref<1x128xf32, #tpu.memory_space<vmem>>, vector<1x128xf32>
    %52 = vector.broadcast %51 : vector<1x128xf32> to vector<16x128xf32>
    %53 = arith.addf %50, %52 : vector<16x128xf32>
    %cst_67 = arith.constant 0.000000e+00 : f32
    %54 = vector.broadcast %cst_67 : f32 to vector<16x128xf32>
    %55 = arith.maximumf %53, %54 : vector<16x128xf32>
    %56 = vector.shape_cast %55 : vector<16x128xf32> to vector<1x16x128xf32>
    %c0_68 = arith.constant 0 : index
    %c0_69 = arith.constant 0 : index
    %c0_70 = arith.constant 0 : index
    %57 = vector.load %arg6[%c0_68, %c0_69, %c0_70] : memref<1x16x128xf32, #tpu.memory_space<vmem>>, vector<1x16x128xf32>
    tpu.vector_store %arg6[%c0_68, %c0_69, %c0_70], %56 {strides = array<i32>} : memref<1x16x128xf32, #tpu.memory_space<vmem>>, vector<1x16x128xf32>,
    return
  }
  func.func @transform_0(%arg0: i32) -> (i32, i32, i32) {
    %c0_i32 = arith.constant 0 : i32
    %c0_i32_0 = arith.constant 0 : i32
    %c0_i32_1 = arith.constant 0 : i32
    return %arg0, %c0_i32, %c0_i32_0 : i32, i32, i32
  }
  func.func @transform_1(%arg0: i32) -> (i32, i32, i32) {
    %c0_i32 = arith.constant 0 : i32
    %c0_i32_0 = arith.constant 0 : i32
    %c0_i32_1 = arith.constant 0 : i32
    %c0_i32_2 = arith.constant 0 : i32
    return %c0_i32, %c0_i32_0, %c0_i32_1 : i32, i32, i32
  }
  func.func @transform_2(%arg0: i32) -> (i32, i32) {
    %c0_i32 = arith.constant 0 : i32
    %c0_i32_0 = arith.constant 0 : i32
    %c0_i32_1 = arith.constant 0 : i32
    return %c0_i32, %c0_i32_0 : i32, i32
  }
  func.func @transform_3(%arg0: i32) -> (i32, i32, i32) {
    %c0_i32 = arith.constant 0 : i32
    %c0_i32_0 = arith.constant 0 : i32
    %c0_i32_1 = arith.constant 0 : i32
    %c0_i32_2 = arith.constant 0 : i32
    return %c0_i32, %c0_i32_0, %c0_i32_1 : i32, i32, i32
  }
  func.func @transform_4(%arg0: i32) -> (i32, i32) {
    %c0_i32 = arith.constant 0 : i32
    %c0_i32_0 = arith.constant 0 : i32
    %c0_i32_1 = arith.constant 0 : i32
    return %c0_i32, %c0_i32_0 : i32, i32
  }
  func.func @transform_5(%arg0: i32) -> (i32, i32, i32) {
    %c0_i32 = arith.constant 0 : i32
    %c0_i32_0 = arith.constant 0 : i32
    %c0_i32_1 = arith.constant 0 : i32
    return %arg0, %c0_i32, %c0_i32_0 : i32, i32, i32
  }
}

</mosaic_0001>

<bundles_post_ra>
// kernel: tile.13
= control target key start
LH: loop header
LB: loop body
LE: loop exit
PB: predicated region body
PF: predicated region fallthrough
CT: control target
= control target key end

     0   :  { %s28_s0 = inlined_call_operand.vmem [shape: f32[8], index: 0, kind: input, shape index: {}]   ;;  %s29_s1 = inlined_call_operand.vmem [shape: f32[16,8], index: 1, kind: output, shape index: {}]  }
   0x1   :  { %v4_v0 = vld [vmem:[%s28_s0] ss:$0 sm:$0xff] }
   0x2   :  { %5 = vst [vmem:[%s29_s1] sm:$0xff] %v4_v0 }
   0x3   :  { %8 = vst [vmem:[%s29_s1 + $0x8] sm:$0xff] %v4_v0 }

// kernel: tile.14
= control target key start
LH: loop header
LB: loop body
LE: loop exit
PB: predicated region body
PF: predicated region fallthrough
CT: control target
= control target key end

     0   :  { %s131_s10 = smov 120   ;;  %s132_s11 = smov 104   ;;  %vm3_vm0 = vcmask 64512   ;;  %vm9_vm1 = vcmask 1048512   ;;  %vm15_vm2 = vcmask 982912   ;;  %vm21_vm3 = vcmask 917312   ;;  %s207_s0 = inlined_call_operand.vmem [shape: f32[16,8], index: 0, kind: input, shape index: {}]   ;;  %s208_s1 = inlined_call_operand.vmem [shape: f32[1,128], index: 1, kind: output, shape index: {}]  }
   0x1   :  { %v101_v0 = vld [vmem:[%s207_s0 + $0xf] sm:$0x1]   ;;  %v103_v1 = vld [vmem:[%s207_s0 + $0xd] sm:$0x1]   ;;  %v105_v2 = vld [vmem:[%s207_s0 + $0xb] sm:$0x1]  }
   0x2   :  { %7 = vrot.lane.b32.xlu0 %v101_v0, %s131_s10  ;;  %19 = vrot.lane.b32.xlu1 %v103_v1, %s132_s11  ;;  %s133_s14 = smov 88   ;;  %v102_v3 = vld [vmem:[%s207_s0 + $0xe] sm:$0x1]   ;;  %v104_v4 = vld [vmem:[%s207_s0 + $0xc] sm:$0x1]   ;;  %s134_s19 = smov 112  }
   0x3   :  { %31 = vrot.lane.b32.xlu2 %v105_v2, %s133_s14  ;;  %s135_s20 = smov 96   ;;  %v106_v5 = vld [vmem:[%s207_s0 + $0xa] sm:$0x1]   ;;  %s136_s23 = smov 80   ;;  %v107_v6 = vld [vmem:[%s207_s0 + $0x9] sm:$0x1]  }
   0x4   :  { %v108_v7 = vld [vmem:[%s207_s0 + $0x8] sm:$0x1]   ;;  %s137_s28 = smov 72   ;;  %s138_s29 = smov 64   ;;  %v109_v8 = vld [vmem:[%s207_s0 + $0x7] sm:$0x1]  }
   0x5   :  { %s139_s3 = smov 56   ;;  %v110_v9 = vld [vmem:[%s207_s0 + $0x6] sm:$0x1]   ;;  %v111_v10 = vld [vmem:[%s207_s0 + $0x5] sm:$0x1]   ;;  %s140_s8 = smov 48  }
   0x6   :  { %s141_s9 = smov 40   ;;  %v112_v11 = vld [vmem:[%s207_s0 + $0x4] sm:$0x1]   ;;  %s142_s12 = smov 32   ;;  %v113_v12 = vld [vmem:[%s207_s0 + $0x3] sm:$0x1]  }
   0x7   :  { %v114_v13 = vld [vmem:[%s207_s0 + $0x2] sm:$0x1]   ;;  %s143_s17 = smov 24   ;;  %s144_s18 = smov 16   ;;  %v115_v14 = vld [vmem:[%s207_s0 + $0x1] sm:$0x1]  }
   0x8   :  { %s145_s21 = smov 8   ;;  %v2_v15 = vld [vmem:[%s207_s0] sm:$0x1]   ;;  %vm27_vm4 = vcmask 851712   ;;  %vm33_vm5 = vcmask 786112   ;;  %vm39_vm6 = vcmask 720512  }
   0x9   :  { %4 = vst.msk [vmem:[#allocation0] sm:$0x1] %vm3_vm0, %v2_v15   ;;  %vm45_vm7 = vcmask 654912   ;;  %vm51_vm8 = vcmask 589312   ;;  %vm57_vm9 = vcmask 523712   ;;  %vm63_vm10 = vcmask 458112  }
   0xa   :  { %13 = vrot.lane.b32.xlu0 %v102_v3, %s134_s19  ;;  %25 = vrot.lane.b32.xlu1 %v104_v4, %s135_s20  ;;  %vm69_vm11 = vcmask 392512   ;;  %vm75_vm12 = vcmask 326912   ;;  %vm81_vm13 = vcmask 261312   ;;  %vm87_vm14 = vcmask 195712  }
   0xb   :  { %37 = vrot.lane.b32.xlu2 %v106_v5, %s136_s23  ;;  %vm93_vm15 = vcmask 130112  }
  0x12   :  { %43 = vrot.lane.b32.xlu0 %v107_v6, %s137_s28  ;;  %49 = vrot.lane.b32.xlu1 %v108_v7, %s138_s29 }
  0x13   :  { %55 = vrot.lane.b32.xlu2 %v109_v8, %s139_s3 }
  0x1a   :  { %61 = vrot.lane.b32.xlu0 %v110_v9, %s140_s8  ;;  %67 = vrot.lane.b32.xlu1 %v111_v10, %s141_s9 }
  0x1b   :  { %73 = vrot.lane.b32.xlu2 %v112_v11, %s142_s12 }
  0x22   :  { %79 = vrot.lane.b32.xlu0 %v113_v12, %s143_s17  ;;  %85 = vrot.lane.b32.xlu1 %v114_v13, %s144_s18 }
  0x23   :  { %91 = vrot.lane.b32.xlu2 %v115_v14, %s145_s21 }
  0x5d   :  { %v32_v16 = vpop.permute.xlu2 %31  }
  0x65   :  { %v38_v17 = vpop.permute.xlu2 %37  }
  0x6d   :  { %v56_v18 = vpop.permute.xlu2 %55  }
  0x74   :  { %v8_v19 = vpop.permute.xlu0 %7   ;;  %v20_v20 = vpop.permute.xlu1 %19  }
  0x75   :  { %10 = vst.msk [vmem:[#allocation0] sm:$0x1] %vm9_vm1, %v8_v19   ;;  %v74_v21 = vpop.permute.xlu2 %73  }
  0x7c   :  { %v14_v22 = vpop.permute.xlu0 %13   ;;  %v26_v23 = vpop.permute.xlu1 %25  }
  0x7d   :  { %16 = vst.msk [vmem:[#allocation0] sm:$0x1] %vm15_vm2, %v14_v22   ;;  %v92_v24 = vpop.permute.xlu2 %91  }
  0x7e   :  { %22 = vst.msk [vmem:[#allocation0] sm:$0x1] %vm21_vm3, %v20_v20  }
  0x7f   :  { %28 = vst.msk [vmem:[#allocation0] sm:$0x1] %vm27_vm4, %v26_v23  }
  0x80   :  { %34 = vst.msk [vmem:[#allocation0] sm:$0x1] %vm33_vm5, %v32_v16  }
  0x81   :  { %40 = vst.msk [vmem:[#allocation0] sm:$0x1] %vm39_vm6, %v38_v17  }
  0x84   :  { %v44_v25 = vpop.permute.xlu0 %43   ;;  %v50_v26 = vpop.permute.xlu1 %49  }
  0x85   :  { %46 = vst.msk [vmem:[#allocation0] sm:$0x1] %vm45_vm7, %v44_v25  }
  0x86   :  { %52 = vst.msk [vmem:[#allocation0] sm:$0x1] %vm51_vm8, %v50_v26  }
  0x87   :  { %58 = vst.msk [vmem:[#allocation0] sm:$0x1] %vm57_vm9, %v56_v18  }
  0x8c   :  { %v62_v27 = vpop.permute.xlu0 %61   ;;  %v68_v28 = vpop.permute.xlu1 %67  }
  0x8d   :  { %64 = vst.msk [vmem:[#allocation0] sm:$0x1] %vm63_vm10, %v62_v27  }
  0x8e   :  { %70 = vst.msk [vmem:[#allocation0] sm:$0x1] %vm69_vm11, %v68_v28  }
  0x8f   :  { %76 = vst.msk [vmem:[#allocation0] sm:$0x1] %vm75_vm12, %v74_v21  }
  0x94   :  { %v80_v29 = vpop.permute.xlu0 %79   ;;  %v86_v30 = vpop.permute.xlu1 %85  }
  0x95   :  { %82 = vst.msk [vmem:[#allocation0] sm:$0x1] %vm81_vm13, %v80_v29  }
  0x96   :  { %88 = vst.msk [vmem:[#allocation0] sm:$0x1] %vm87_vm14, %v86_v30  }
  0x97   :  { %94 = vst.msk [vmem:[#allocation0] sm:$0x1] %vm93_vm15, %v92_v24  }
  0x9e   :  { %v97_v31 = vld [vmem:[#allocation0] sm:$0x1] }
  0x9f   :  { %100 = vst [vmem:[%s208_s1] sm:$0x1] %v97_v31 }

// kernel: _lambda_.1
= control target key start
LH: loop header
LB: loop body
LE: loop exit
PB: predicated region body
PF: predicated region fallthrough
CT: control target
= control target key end

     0   :  { %s675_s18 = smov 0   ;;  %s929_s0 = inlined_call_operand.vmem [shape: f32[2,16,64], index: 0, kind: input, shape index: {}]   ;;  %s930_s1 = inlined_call_operand.vmem [shape: f32[3,64,128], index: 1, kind: input, shape index: {}]   ;;  %s931_s2 = inlined_call_operand.vmem [shape: f32[1,128], index: 2, kind: input, shape index: {}]   ;;  %s932_s3 = inlined_call_operand.vmem [shape: f32[3,128,128], index: 3, kind: input, shape index: {}]   ;;  %s933_s4 = inlined_call_operand.vmem [shape: f32[1,128], index: 4, kind: input, shape index: {}]   ;;  %s934_s5 = inlined_call_operand.vmem [shape: f32[2,16,128], index: 5, kind: output, shape index: {}]  }
   0x1 LB: > { %s558_s19 = sadd.s32 4294967295, %s642_s18   ;;  %p562_p0 = scmp.ge.s32.totalorder %s642_s18, 1  ;;  %s642_s18 = sphi %s675_s18, %s15_s18  }
   0x2   : > { %p187_p1 = scmp.lt.s32.totalorder %s642_s18, 3 }
   0x4   : > { %p188_p2 = pnand %p562_p0, %p187_p1 }
   0x5   : > { %p215_p3 = scmp.lt.s32.totalorder (!%p188_p2), %s558_s19, 1 }
   0x6   : > { %191 = sbr.rel (%p188_p2) target bundleno = 339 (0x153), region = 40 }
   0xb   : > { %v574_v0 = vld [vmem:[%s930_s1 + $0x78] sm:$0xff]  ;;  %v573_v1 = vld [vmem:[%s930_s1 + $0x70] sm:$0xff]  ;;  %vm225_vm0 = vcmask 516096   ;;  %v572_v3 = vld [vmem:[%s930_s1 + $0x68] sm:$0xff]  ;;  %s936_s19 = smov (!%p215_p3, %s558_s19), 1  ;;  %v644_v5 = vmov 0.0  }
   0xc   : > { %268 = vmatpush.msra.mxu2 %v574_v0  ;;  %v242_v2 = vld [vmem:[%s930_s1 + $0x38] sm:$0xff]  ;;  %v241_v4 = vld [vmem:[%s930_s1 + $0x30] sm:$0xff]  ;;  %226 = vst.msk [vmem:[#allocation2] sm:$0x1] %vm225_vm0, %v644_v5  ;;  %v240_v6 = vld [vmem:[%s930_s1 + $0x28] sm:$0xff]  ;;  %s623_s9 = sshll.u32 %s936_s19, 4 }
   0xd   : > { %297 = vmatpush.msra.mxu1 %v242_v2  ;;  %227 = vst.msk [vmem:[#allocation2 + $0x11] sm:$0x1] %vm225_vm0, %v644_v5  ;;  %v571_v7 = vld [vmem:[%s930_s1 + $0x60] sm:$0xff]  ;;  %vm230_vm1 = vcmask 523264   ;;  %s219_s14 = scalar_lea.vmem %s929_s0, %s623_s9  ;;  %v570_v9 = vld [vmem:[%s930_s1 + $0x58] sm:$0xff]  ;;  %v569_v13 = vld [vmem:[%s930_s1 + $0x50] sm:$0xff]  ;;  %s224_s17 = scalar_lea.vmem %s934_s5, %s623_s9 }
   0xe   : > { %269 = vmatpush.msra.mxu2 %v573_v1  ;;  %362 = vst [vmem:[#allocation3] sm:$0x1] %v644_v5  ;;  %v239_v8 = vld [vmem:[%s930_s1 + $0x20] sm:$0xff]  ;;  %v229_v11 = vld [vmem:[%s219_s14 + $0x8] sm:$0xff]  ;;  %v238_v12 = vld [vmem:[%s930_s1 + $0x18] sm:$0xff] }
   0xf   : > { %298 = vmatpush.msra.mxu1 %v241_v4  ;;  %363 = vst [vmem:[#allocation3 + $0x11] sm:$0x1] %v644_v5  ;;  %v228_v10 = vld [vmem:[%s219_s14] sm:$0xff]  ;;  %v237_v14 = vld [vmem:[%s930_s1 + $0x10] sm:$0xff]  ;;  %v568_v15 = vld [vmem:[%s930_s1 + $0x48] sm:$0xff] }
  0x10   : > { %270 = vmatpush.msra.mxu2 %v572_v3  ;;  %231 = vst.msk [vmem:[#allocation2 + $0x1] sm:$0xff] %vm230_vm1, %v228_v10  ;;  %v236_v16 = vld [vmem:[%s930_s1 + $0x8] sm:$0xff]  ;;  %v567_v17 = vld [vmem:[%s930_s1 + $0x40] sm:$0xff]  ;;  %v586_v20 = vld [vmem:[%s930_s1 + $0xb8] sm:$0xff] }
  0x11   : > { %299 = vmatpush.msra.mxu1 %v240_v6  ;;  %232 = vst.msk [vmem:[#allocation2 + $0x9] sm:$0xff] %vm230_vm1, %v229_v11  ;;  %v235_v18 = vld [vmem:[%s930_s1] sm:$0xff]  ;;  %v585_v22 = vld [vmem:[%s930_s1 + $0xb0] sm:$0xff]  ;;  %v584_v23 = vld [vmem:[%s930_s1 + $0xa8] sm:$0xff] }
  0x12   : > { %271 = vmatpush.msra.mxu2 %v571_v7  ;;  %v583_v24 = vld [vmem:[%s930_s1 + $0xa0] sm:$0xff]  ;;  %v582_v26 = vld [vmem:[%s930_s1 + $0x98] sm:$0xff]  ;;  %v581_v28 = vld [vmem:[%s930_s1 + $0x90] sm:$0xff] }
  0x13   : > { %300 = vmatpush.msra.mxu1 %v239_v8  ;;  %v580_v29 = vld [vmem:[%s930_s1 + $0x88] sm:$0xff]  ;;  %v579_v30 = vld [vmem:[%s930_s1 + $0x80] sm:$0xff]  ;;  %v604_v33 = vld [vmem:[%s932_s3 + $0xf8] sm:$0xff] }
  0x14   : > { %272 = vmatpush.msra.mxu2 %v570_v9  ;;  %403 = vmatpush.msra.mxu3 %v604_v33  ;;  %v603_v34 = vld [vmem:[%s932_s3 + $0xf0] sm:$0xff]  ;;  %v602_v35 = vld [vmem:[%s932_s3 + $0xe8] sm:$0xff]  ;;  %v601_v36 = vld [vmem:[%s932_s3 + $0xe0] sm:$0xff] }
  0x15   : > { %301 = vmatpush.msra.mxu1 %v238_v12  ;;  %v383_v37 = vld [vmem:[%s932_s3 + $0x78] sm:$0xff]  ;;  %v382_v39 = vld [vmem:[%s932_s3 + $0x70] sm:$0xff]  ;;  %v381_v40 = vld [vmem:[%s932_s3 + $0x68] sm:$0xff] }
  0x16   : > { %273 = vmatpush.msra.mxu2 %v569_v13  ;;  %404 = vmatpush.msra.mxu3 %v603_v34  ;;  %v600_v38 = vld [vmem:[%s932_s3 + $0xd8] sm:$0xff]  ;;  %v599_v41 = vld [vmem:[%s932_s3 + $0xd0] sm:$0xff]  ;;  %v380_v42 = vld [vmem:[%s932_s3 + $0x60] sm:$0xff] }
  0x17   : > { %302 = vmatpush.msra.mxu1 %v237_v14  ;;  %v243_v19 = vld [vmem:[#allocation2 + $0x1] sm:$0xff]  ;;  %426 = vmatpush.msra.mxu0 %v383_v37  ;;  %v379_v45 = vld [vmem:[%s932_s3 + $0x58] sm:$0xff]  ;;  %v378_v48 = vld [vmem:[%s932_s3 + $0x50] sm:$0xff] }
  0x18   : > { %274 = vmatpush.msra.mxu2 %v568_v15  ;;  %v233_v21 = vld [vmem:[#allocation2] sm:$0xff]  ;;  %v244_v25 = vld [vmem:[#allocation2 + $0x9] sm:$0xff]  ;;  %405 = vmatpush.msra.mxu3 %v602_v35  ;;  %v620_v46 = vld [vmem:[%s932_s3 + $0x178] sm:$0xff] }
  0x19   : > { %303 = vmatpush.msra.mxu1 %v236_v16  ;;  %v234_v27 = vld [vmem:[#allocation2 + $0x8] sm:$0xff]  ;;  %427 = vmatpush.msra.mxu0 %v382_v39  ;;  %v597_v44 = vld [vmem:[%s932_s3 + $0xc0] sm:$0xff]  ;;  %v596_v47 = vld [vmem:[%s932_s3 + $0xb8] sm:$0xff] }
  0x1a   : > { %275 = vmatpush.msra.mxu2 %v567_v17  ;;  %v312_v31 = vld [vmem:[#allocation2 + $0x2] sm:$0xff]  ;;  %v313_v32 = vld [vmem:[#allocation2 + $0xa] sm:$0xff]  ;;  %406 = vmatpush.msra.mxu3 %v601_v36  ;;  %v375_v57 = vld [vmem:[%s932_s3 + $0x38] sm:$0xff] }
  0x1b   : > { %575 = vmatmul.msk.f32.vlgmr.msra.gmra.mxu2 %vm230_vm1, %v243_v19  ;;  %304 = vmatpush.msra.mxu1 %v235_v18  ;;  %v598_v43 = vld [vmem:[%s932_s3 + $0xc8] sm:$0xff]  ;;  %v619_v49 = vld [vmem:[%s932_s3 + $0x170] sm:$0xff]  ;;  %v376_v52 = vld [vmem:[%s932_s3 + $0x40] sm:$0xff] }
  0x1c   : > { %337 = vmatpush.msrb.mxu2 %v586_v20  ;;  %577 = vmatmul.msk.f32.vlgmr.msra.gmra.mxu1 %vm230_vm1, %v233_v21  ;;  %v377_v50 = vld [vmem:[%s932_s3 + $0x48] sm:$0xff]  ;;  %v617_v53 = vld [vmem:[%s932_s3 + $0x160] sm:$0xff]  ;;  %v595_v54 = vld [vmem:[%s932_s3 + $0xb0] sm:$0xff] }
  0x1d   : > { %407 = vmatpush.msra.mxu3 %v600_v38  ;;  %428 = vmatpush.msra.mxu0 %v381_v40  ;;  %v618_v51 = vld [vmem:[%s932_s3 + $0x168] sm:$0xff]  ;;  %v593_v56 = vld [vmem:[%s932_s3 + $0xa0] sm:$0xff]  ;;  %v616_v58 = vld [vmem:[%s932_s3 + $0x158] sm:$0xff] }
  0x1e   : > { %338 = vmatpush.msrb.mxu2 %v585_v22  ;;  %468 = vmatpush.msrb.mxu1 %v620_v46  ;;  %v594_v55 = vld [vmem:[%s932_s3 + $0xa8] sm:$0xff]  ;;  %v592_v59 = vld [vmem:[%s932_s3 + $0x98] sm:$0xff]  ;;  %v374_v60 = vld [vmem:[%s932_s3 + $0x30] sm:$0xff] }
  0x1f   : > { %408 = vmatpush.msra.mxu3 %v599_v41  ;;  %429 = vmatpush.msra.mxu0 %v380_v42  ;;  %v615_v61 = vld [vmem:[%s932_s3 + $0x150] sm:$0xff]  ;;  %v373_v63 = vld [vmem:[%s932_s3 + $0x28] sm:$0xff]  ;;  %v372_v2 = vld [vmem:[%s932_s3 + $0x20] sm:$0xff] }
  0x20   : > { %339 = vmatpush.msrb.mxu2 %v584_v23  ;;  %469 = vmatpush.msrb.mxu1 %v619_v49  ;;  %v591_v62 = vld [vmem:[%s932_s3 + $0x90] sm:$0xff]  ;;  %v614_v0 = vld [vmem:[%s932_s3 + $0x148] sm:$0xff]  ;;  %v613_v3 = vld [vmem:[%s932_s3 + $0x140] sm:$0xff] }
  0x21   : > { %409 = vmatpush.msra.mxu3 %v598_v43  ;;  %430 = vmatpush.msra.mxu0 %v379_v45  ;;  %v590_v1 = vld [vmem:[%s932_s3 + $0x88] sm:$0xff]  ;;  %v589_v4 = vld [vmem:[%s932_s3 + $0x80] sm:$0xff]  ;;  %v371_v5 = vld [vmem:[%s932_s3 + $0x18] sm:$0xff] }
  0x22   : > { %340 = vmatpush.msrb.mxu2 %v583_v24  ;;  %470 = vmatpush.msrb.mxu1 %v618_v51  ;;  %v612_v6 = vld [vmem:[%s932_s3 + $0x138] sm:$0xff]  ;;  %v370_v7 = vld [vmem:[%s932_s3 + $0x10] sm:$0xff]  ;;  %v369_v9 = vld [vmem:[%s932_s3 + $0x8] sm:$0xff] }
  0x23   : > { %576 = vmatmul.msk.f32.gmra.mxu2 %vm230_vm1, %v244_v25  ;;  %410 = vmatpush.msra.mxu3 %v597_v44  ;;  %v611_v8 = vld [vmem:[%s932_s3 + $0x130] sm:$0xff]  ;;  %v610_v10 = vld [vmem:[%s932_s3 + $0x128] sm:$0xff]  ;;  %v368_v11 = vld [vmem:[%s932_s3] sm:$0xff] }
  0x24   : > { %341 = vmatpush.msrb.mxu2 %v582_v26  ;;  %578 = vmatmul.msk.f32.gmra.mxu1 %vm230_vm1, %v234_v27  ;;  %v609_v12 = vld [vmem:[%s932_s3 + $0x120] sm:$0xff]  ;;  %v608_v13 = vld [vmem:[%s932_s3 + $0x118] sm:$0xff]  ;;  %v607_v14 = vld [vmem:[%s932_s3 + $0x110] sm:$0xff] }
  0x25   : > { %411 = vmatpush.msra.mxu3 %v596_v47  ;;  %431 = vmatpush.msra.mxu0 %v378_v48  ;;  %v606_v16 = vld [vmem:[%s932_s3 + $0x108] sm:$0xff]  ;;  %v605_v17 = vld [vmem:[%s932_s3 + $0x100] sm:$0xff] }
  0x26   : > { %342 = vmatpush.msrb.mxu2 %v581_v28  ;;  %471 = vmatpush.msrb.mxu1 %v617_v53  ;;  %v634_v21 = vld [vmem:[%s931_s2] ss:$0 sm:$0xff] }
  0x27   : > { %432 = vmatpush.msra.mxu0 %v377_v50  ;;  %412 = vmatpush.msra.mxu3 %v595_v54  ;;  %v635_v39 = vld [vmem:[%s933_s4] ss:$0 sm:$0xff] }
  0x28   : > { %343 = vmatpush.msrb.mxu2 %v580_v29  ;;  %472 = vmatpush.msrb.mxu1 %v616_v58 }
  0x29   : > { %433 = vmatpush.msra.mxu0 %v376_v52  ;;  %413 = vmatpush.msra.mxu3 %v594_v55 }
  0x2a   : > { %344 = vmatpush.msrb.mxu2 %v579_v30  ;;  %473 = vmatpush.msrb.mxu1 %v615_v61 }
  0x2b   : > { %587 = vmatmul.msk.f32.vlgmr.msrb.gmra.mxu2 %vm230_vm1, %v312_v31  ;;  %434 = vmatpush.msra.mxu0 %v375_v57 }
  0x2c   : > { %414 = vmatpush.msra.mxu3 %v593_v56  ;;  %474 = vmatpush.msrb.mxu1 %v614_v0 }
  0x2d   : > { %435 = vmatpush.msra.mxu0 %v374_v60 }
  0x2e   : > { %415 = vmatpush.msra.mxu3 %v592_v59  ;;  %475 = vmatpush.msrb.mxu1 %v613_v3 }
  0x2f   : > { %436 = vmatpush.msra.mxu0 %v373_v63 }
  0x30   : > { %416 = vmatpush.msra.mxu3 %v591_v62  ;;  %476 = vmatpush.msrb.mxu1 %v612_v6 }
  0x31   : > { %437 = vmatpush.msra.mxu0 %v372_v2 }
  0x32   : > { %417 = vmatpush.msra.mxu3 %v590_v1  ;;  %477 = vmatpush.msrb.mxu1 %v611_v8 }
  0x33   : > { %588 = vmatmul.msk.f32.gmra.mxu2 %vm230_vm1, %v313_v32  ;;  %438 = vmatpush.msra.mxu0 %v371_v5 }
  0x34   : > { %418 = vmatpush.msra.mxu3 %v589_v4  ;;  %478 = vmatpush.msrb.mxu1 %v610_v10 }
  0x35   : > { %439 = vmatpush.msra.mxu0 %v370_v7 }
  0x36   : > { %479 = vmatpush.msrb.mxu1 %v609_v12 }
  0x37   : > { %440 = vmatpush.msra.mxu0 %v369_v9 }
  0x38   : > { %480 = vmatpush.msrb.mxu1 %v608_v13 }
  0x39   : > { %441 = vmatpush.msra.mxu0 %v368_v11 }
  0x3a   : > { %481 = vmatpush.msrb.mxu1 %v607_v14 }
  0x3c   : > { %482 = vmatpush.msrb.mxu1 %v606_v16 }
  0x3e   : > { %483 = vmatpush.msrb.mxu1 %v605_v17 }
  0x99   : > { %v306_v19 = vpop.f32.mrf.mxu1 }
  0x9e   : > { %v277_v15 = vpop.f32.mrf.mxu2 }
  0x9f   : > { %v307_v20 = vadd.f32 %v306_v19, %v277_v15 }
  0xa1   : > { %v309_v25 = vpop.f32.mrf.mxu1 }
  0xa6   : > { %v280_v18 = vpop.f32.mrf.mxu2 }
  0xa7   : > { %v310_v27 = vadd.f32 %v309_v25, %v280_v18 }
  0xae   : > { %v346_v22 = vpop.f32.mrf.mxu2 }
  0xaf   : > { %v352_v23 = vadd.f32 %v346_v22, %v307_v20 }
  0xb1   : > { %v358_v24 = vadd.f32 %v634_v21, %v352_v23 }
  0xb3   : > { %v360_v26 = vmax.f32 %v358_v24, 0.0 }
  0xb5   : > { %364 = vst [vmem:[#allocation3 + $0x1] sm:$0xff] %v360_v26  ;;  %419 = vmatmul.f32.vlgmr.msra.gmra.mxu3 %v360_v26 }
  0xb6   : > { %v349_v28 = vpop.f32.mrf.mxu2 }
  0xb7   : > { %v353_v29 = vadd.f32 %v349_v28, %v310_v27 }
  0xb9   : > { %v359_v30 = vadd.f32 %v634_v21, %v353_v29 }
  0xbb   : > { %v361_v31 = vmax.f32 %v359_v30, 0.0 }
  0xbc   : > { %v366_v32 = vld [vmem:[#allocation3] sm:$0xff] }
  0xbd   : > { %365 = vst [vmem:[#allocation3 + $0x9] sm:$0xff] %v361_v31  ;;  %442 = vmatmul.f32.vlgmr.msra.gmra.mxu0 %v366_v32  ;;  %422 = vmatmul.f32.gmra.mxu3 %v361_v31 }
  0xc4   : > { %v367_v33 = vld [vmem:[#allocation3 + $0x8] sm:$0xff] }
  0xc5   : > { %v449_v34 = vld [vmem:[#allocation3 + $0x2] sm:$0xff]  ;;  %445 = vmatmul.f32.gmra.mxu0 %v367_v33  ;;  %v450_v35 = vld [vmem:[#allocation3 + $0xa] sm:$0xff] }
  0xc6   : > { %484 = vmatmul.f32.vlgmr.msrb.gmra.mxu1 %v449_v34 }
  0xce   : > { %487 = vmatmul.f32.gmra.mxu1 %v450_v35 }
 0x138   : > { %v420_v37 = vpop.f32.mrf.mxu3 }
 0x13a   : > { %v443_v36 = vpop.f32.mrf.mxu0 }
 0x13b   : > { %v444_v38 = vadd.f32 %v443_v36, %v420_v37 }
 0x140   : > { %v423_v45 = vpop.f32.mrf.mxu3 }
 0x142   : > { %v446_v43 = vpop.f32.mrf.mxu0 }
 0x143   : > { %v485_v40 = vpop.f32.mrf.mxu1  ;;  %v447_v46 = vadd.f32 %v446_v43, %v423_v45 }
 0x144   : > { %v491_v41 = vadd.f32 %v485_v40, %v444_v38 }
 0x146   : > { %v497_v42 = vadd.f32 %v635_v39, %v491_v41 }
 0x148   : > { %v499_v44 = vmax.f32 %v497_v42, 0.0 }
 0x14a   : > { %501 = vst [vmem:[%s224_s17] sm:$0xff] %v499_v44 }
 0x14b   : > { %v488_v47 = vpop.f32.mrf.mxu1 }
 0x14c   : > { %v492_v48 = vadd.f32 %v488_v47, %v447_v46 }
 0x14e   : > { %v498_v49 = vadd.f32 %v635_v39, %v492_v48 }
 0x150   : > { %v500_v50 = vmax.f32 %v498_v49, 0.0 }
 0x152   : > { %502 = vst [vmem:[%s224_s17 + $0x8] sm:$0xff] %v500_v50 }
 0x153 PF: > { %s15_s18 = sadd.s32 1, %s642_s18  }
 0x154   : > { %p12_p4 = scmp.ge.s32.totalorder %s15_s18, 4  }
 0x156   :  { %14 = sbr.rel (!%p12_p4) target bundleno = 1 (0x1), region = 74 }

</bundles_post_ra>
